<compile_context>
chip_gen: v7x
topology: tpu7x:2x2x1
jax: 0.10.0
libtpu: 0.0.40
codegen_flags: <defaults>
</compile_context>

<pallas_src>
import functools

import jax
import jax.numpy as jnp
from jax.experimental import pallas as pl
from jax.experimental.pallas import tpu as pltpu


_TARGET_BLOCK_BYTES = 2 * 1024 * 1024    # ~2 MiB/step is at the HBM-roofline knee
_MAX_TB_UNROLL = 8                       # cap on the in-kernel per-sample unroll
_VMEM_LIMIT_CAP = 80 * 1024 * 1024       # never request more scoped VMEM than this


def _tpu_caps():
    """Return (per-core VMEM bytes, TensorCores per chip); conservative on failure."""
    vmem, cores = 64 << 20, 2            # v7x-safe defaults
    try:
        kind = jax.devices()[0].device_kind.lower()
        if "v7" in kind:
            vmem, cores = 64 << 20, 2    # v7x: 64 MiB VMEM per TC, 2 TCs/chip
        else:
            vmem, cores = 128 << 20, 1   # v5e / v6e (and older): 128 MiB, 1 TC/device
    except Exception:
        pass
    try:
        # If the Pallas hardware query is available, trust it for VMEM (take the min).
        vmem = min(vmem, int(pltpu.get_tpu_info().vmem_capacity_bytes))
    except Exception:
        pass
    return vmem, cores


# ----------------------------------------------------------------------------
# Kernels
# ----------------------------------------------------------------------------
def _se_fused_kernel(x_ref, w1_ref, w2_ref, o_ref, *, inv_hw):
    """Single-pass path: block = (tb, C, HW), whole samples resident in VMEM."""
    w1 = w1_ref[...]                                                  # (Cr, C)
    w2 = w2_ref[...]                                                  # (C, Cr)
    for b in range(x_ref.shape[0]):                                   # small static unroll
        xb = x_ref[b]                                                 # (C, HW)
        # Squeeze: spatial mean in f32; keepdims keeps C on sublanes with a
        # trailing singleton lane (no relayout needed downstream).
        # TODO(synk): on v7x bf16, consider an MXU ones-contraction for the
        # reduction if a bundle dump shows VPU (cast+add) saturating before HBM.
        mean = jnp.sum(xb, axis=-1, keepdims=True,
                       dtype=jnp.float32) * inv_hw                    # (C, 1)
        # Excitation: tiny mat-vecs in the original PyTorch weight layout,
        # operands in the weight dtype, f32 accumulation.
        h = jnp.maximum(
            jnp.dot(w1, mean.astype(w1.dtype),
                    preferred_element_type=jnp.float32), 0.0)         # (Cr, 1)
        s = jax.nn.sigmoid(
            jnp.dot(w2, h.astype(w2.dtype),
                    preferred_element_type=jnp.float32))              # (C, 1)
        # Scale: trailing-singleton broadcast along the HW lanes.
        o_ref[b] = xb * s.astype(xb.dtype)                            # (C, HW)


def _se_gates_kernel(x_ref, w1_ref, w2_ref, g_ref, acc_ref, *,
                     inv_hw, hw, thw, needs_mask):
    """Split path, pass 1: spatially-tiled reduction -> per-sample gates (C, 1)."""
    t = pl.program_id(1)

    @pl.when(t == 0)
    def _():
        acc_ref[...] = jnp.zeros_like(acc_ref)

    x = x_ref[0]                                                      # (C, thw)
    if needs_mask:                                                    # ragged last tile
        lane = jax.lax.broadcasted_iota(jnp.int32, x.shape, 1) + t * thw
        x = jnp.where(lane < hw, x, jnp.zeros_like(x))
    acc_ref[...] += jnp.sum(x, axis=-1, keepdims=True,
                            dtype=jnp.float32)                        # (C, 1)

    @pl.when(t == pl.num_programs(1) - 1)
    def _():
        mean = acc_ref[...] * inv_hw                                  # (C, 1) f32
        w1 = w1_ref[...]
        w2 = w2_ref[...]
        h = jnp.maximum(
            jnp.dot(w1, mean.astype(w1.dtype),
                    preferred_element_type=jnp.float32), 0.0)         # (Cr, 1)
        s = jax.nn.sigmoid(
            jnp.dot(w2, h.astype(w2.dtype),
                    preferred_element_type=jnp.float32))              # (C, 1)
        g_ref[...] = s[None]                                          # (1, C, 1) f32


def _se_scale_kernel(x_ref, g_ref, o_ref):
    """Split path, pass 2: elementwise x * gate (trailing-1 lane broadcast)."""
    x = x_ref[...]                                                    # (1, C, thw)
    o_ref[...] = x * g_ref[...].astype(x.dtype)                       # (1, C, 1) bcast


# ----------------------------------------------------------------------------
# Wrapper
# ----------------------------------------------------------------------------
def se_layer(x, w1, w2, *, max_block_bytes=None):
    """SELayer forward.

    x:  (B, C, H, W) NCHW input.
    w1: (C // r, C)  first nn.Linear weight (PyTorch (out, in) layout, no bias).
    w2: (C, C // r)  second nn.Linear weight.
    """
    B, C, H, W = x.shape
    Cr, c_in = w1.shape
    assert c_in == C and w2.shape == (C, Cr)
    HW = H * W
    itemsize = jnp.dtype(x.dtype).itemsize
    inv_hw = 1.0 / HW

    # Native-layout view: a free reshape, not an HBM transpose.
    x3 = x.reshape(B, C, HW)

    vmem_cap, num_tc = _tpu_caps()
    vmem_limit = min(vmem_cap * 5 // 8, _VMEM_LIMIT_CAP)   # 40 MiB (v7x) / 80 MiB (v5e/v6e)
    w_bytes = (w1.size + w2.size) * jnp.dtype(w1.dtype).itemsize
    # Per-step working set ~= 2x double-buffered in + 2x out + ~1x temps = 5 blocks.
    block_cap = max(0, vmem_limit - 2 * w_bytes - (2 << 20)) // 5
    if max_block_bytes is not None:                         # test / tuning override
        block_cap = max_block_bytes

    per_sample = C * HW * itemsize
    cparams = dict(vmem_limit_bytes=vmem_limit)

    if per_sample <= block_cap:
        # ---------------- fused path: x read once, written once ----------------
        max_tb = min(max(1, block_cap // per_sample), _MAX_TB_UNROLL, B)
        if num_tc >= 2 and B >= 2:
            # Keep >= 2 grid steps so both v7x TensorCores stream data.
            max_tb = min(max_tb, max(1, B // 2))
        # Smallest batch tile reaching the ~2 MiB/step target, else largest that fits.
        tb = 1
        for d in range(1, B + 1):
            if B % d or d > max_tb:
                continue
            tb = d
            if d * per_sample >= _TARGET_BLOCK_BYTES:
                break
        # TODO(synk): for B == 1 on v7x the whole pass runs on one TensorCore; a
        # tree-reduced spatial split would be needed to engage the second TC.

        cost = pl.CostEstimate(
            flops=int(B * (2 * HW * C + 4 * C * Cr)),
            transcendentals=int(B * C),
            bytes_accessed=int(2 * B * HW * C * itemsize + w_bytes),
        )
        out3 = pl.pallas_call(
            functools.partial(_se_fused_kernel, inv_hw=inv_hw),
            out_shape=jax.ShapeDtypeStruct((B, C, HW), x.dtype),
            grid_spec=pltpu.PrefetchScalarGridSpec(
                num_scalar_prefetch=0,
                grid=(B // tb,),
                in_specs=[
                    pl.BlockSpec((tb, C, HW), lambda i: (i, 0, 0)),
                    pl.BlockSpec((Cr, C), lambda i: (0, 0)),
                    pl.BlockSpec((C, Cr), lambda i: (0, 0)),
                ],
                out_specs=pl.BlockSpec((tb, C, HW), lambda i: (i, 0, 0)),
            ),
            compiler_params=pltpu.CompilerParams(
                dimension_semantics=("parallel",), **cparams),
            cost_estimate=cost,
        )(x3, w1, w2)
    else:
        # ------- split path: spatially-tiled reduction -> gates, then scale -------
        lane_cap = block_cap // max(1, C * itemsize)
        if HW <= max(lane_cap, 128):
            # TODO(synk): pathological huge-C / tiny-HW samples would need channel
            # tiling; fall back to a single spatial tile (still under vmem_limit).
            thw, nt, needs_mask = HW, 1, False
        else:
            thw = max(128, (lane_cap // 128) * 128)        # lane-aligned spatial tile
            nt = -(-HW // thw)                             # cdiv; ragged last tile masked
            needs_mask = (HW % thw) != 0

        gates_cost = pl.CostEstimate(
            flops=int(B * (HW * C + 4 * C * Cr)),
            transcendentals=int(B * C),
            bytes_accessed=int(B * HW * C * itemsize + w_bytes + B * C * 4),
        )
        gates = pl.pallas_call(
            functools.partial(_se_gates_kernel, inv_hw=inv_hw, hw=HW, thw=thw,
                              needs_mask=needs_mask),
            out_shape=jax.ShapeDtypeStruct((B, C, 1), jnp.float32),
            grid_spec=pltpu.PrefetchScalarGridSpec(
                num_scalar_prefetch=0,
                grid=(B, nt),
                in_specs=[
                    pl.BlockSpec((1, C, thw), lambda b, t: (b, 0, t)),
                    pl.BlockSpec((Cr, C), lambda b, t: (0, 0)),
                    pl.BlockSpec((C, Cr), lambda b, t: (0, 0)),
                ],
                out_specs=pl.BlockSpec((1, C, 1), lambda b, t: (b, 0, 0)),
                scratch_shapes=[pltpu.VMEM((C, 1), jnp.float32)],
            ),
            compiler_params=pltpu.CompilerParams(
                dimension_semantics=("parallel", "arbitrary"), **cparams),
            cost_estimate=gates_cost,
        )(x3, w1, w2)

        scale_cost = pl.CostEstimate(
            flops=int(B * HW * C),
            transcendentals=0,
            bytes_accessed=int(2 * B * HW * C * itemsize + B * C * 4),
        )
        out3 = pl.pallas_call(
            _se_scale_kernel,
            out_shape=jax.ShapeDtypeStruct((B, C, HW), x.dtype),
            grid_spec=pltpu.PrefetchScalarGridSpec(
                num_scalar_prefetch=0,
                grid=(B, nt),
                in_specs=[
                    pl.BlockSpec((1, C, thw), lambda b, t: (b, 0, t)),
                    pl.BlockSpec((1, C, 1), lambda b, t: (b, 0, 0)),
                ],
                out_specs=pl.BlockSpec((1, C, thw), lambda b, t: (b, 0, t)),
            ),
            compiler_params=pltpu.CompilerParams(
                dimension_semantics=("parallel", "parallel"), **cparams),
            cost_estimate=scale_cost,
        )(x3, gates)

    return out3.reshape(B, C, H, W)


# ----------------------------------------------------------------------------
# Reference + test
# ----------------------------------------------------------------------------
def _reference(x, w1, w2):
    # Pure-JAX mirror of the PyTorch forward.
    y = jnp.mean(x, axis=(2, 3))                 # (B, C)
    y = jnp.maximum(y @ w1.T, 0.0)               # (B, C//r)
    y = jax.nn.sigmoid(y @ w2.T)                 # (B, C)
    return x * y[:, :, None, None]


if __name__ == "__main__":
    B, C, H, W = 2, 32, 16, 16
    reduction = 16
    Cr = C // reduction

    key = jax.random.PRNGKey(0)
    kx, k1, k2 = jax.random.split(key, 3)
    x = jax.random.normal(kx, (B, C, H, W), dtype=jnp.float32)
    # Deterministic synthetic weights in PyTorch nn.Linear layout (out, in).
    w1 = jax.random.normal(k1, (Cr, C), dtype=jnp.float32) * 0.1
    w2 = jax.random.normal(k2, (C, Cr), dtype=jnp.float32) * 0.1

    ref = _reference(x, w1, w2)

    # Fused (sample-resident) path.
    out = jax.block_until_ready(se_layer(x, w1, w2))
    assert out.shape == (B, C, H, W)
    assert jnp.allclose(out, ref, atol=1e-5, rtol=1e-5), "fused path mismatch"

    # Force the split (spatially tiled reduction + scale) path.
    out_split = jax.block_until_ready(
        se_layer(x, w1, w2, max_block_bytes=16 * 1024))
    assert jnp.allclose(out_split, ref, atol=1e-5, rtol=1e-5), "split path mismatch"

    # Split path with a ragged (masked) last spatial tile and B=1.
    x2 = jax.random.normal(kx, (1, C, 12, 12), dtype=jnp.float32)
    ref2 = _reference(x2, w1, w2)
    out2 = jax.block_until_ready(
        se_layer(x2, w1, w2, max_block_bytes=8 * 1024))
    assert jnp.allclose(out2, ref2, atol=1e-5, rtol=1e-5), "masked split path mismatch"

    print("KERNEL_OK")
</pallas_src>

<mosaic_0001>
module attributes {stable_mosaic.version = 11 : i64} {
  func.func @_se_fused_kernel(%arg0: i32, %arg1: memref<2x32x256xf32, #tpu.memory_space<vmem>>, %arg2: memref<2x32xf32, #tpu.memory_space<vmem>>, %arg3: memref<32x2xf32, #tpu.memory_space<vmem>>, %arg4: memref<2x32x256xf32, #tpu.memory_space<vmem>>) attributes {dimension_semantics = [#tpu.dimension_semantics<parallel>], iteration_bounds = array<i64: 1>, scalar_prefetch = 0 : i64, scratch_operands = 0 : i64, tpu.core_type = #tpu.core_type<tc>, window_params = [{transform_indices = @transform_0, window_bounds = array<i64: 2, 32, 256>}, {pipeline_mode = #tpu.pipeline_mode<synchronous>, transform_indices = @transform_1, window_bounds = array<i64: 2, 32>}, {pipeline_mode = #tpu.pipeline_mode<synchronous>, transform_indices = @transform_2, window_bounds = array<i64: 32, 2>}, {transform_indices = @transform_3, window_bounds = array<i64: 2, 32, 256>}]} {
    %c0 = arith.constant 0 : index
    %c0_0 = arith.constant 0 : index
    %0 = vector.load %arg2[%c0, %c0_0] : memref<2x32xf32, #tpu.memory_space<vmem>>, vector<2x32xf32>
    %c0_1 = arith.constant 0 : index
    %c0_2 = arith.constant 0 : index
    %1 = vector.load %arg3[%c0_1, %c0_2] : memref<32x2xf32, #tpu.memory_space<vmem>>, vector<32x2xf32>
    %c0_3 = arith.constant 0 : index
    %c0_4 = arith.constant 0 : index
    %c0_5 = arith.constant 0 : index
    %2 = vector.load %arg1[%c0_3, %c0_4, %c0_5] : memref<2x32x256xf32, #tpu.memory_space<vmem>>, vector<1x32x256xf32>
    %3 = vector.shape_cast %2 : vector<1x32x256xf32> to vector<32x256xf32>
    %cst = arith.constant dense<0.000000e+00> : vector<32xf32>
    %4 = vector.multi_reduction <add>, %3, %cst [1] : vector<32x256xf32> to vector<32xf32>
    %5 = vector.shape_cast %4 : vector<32xf32> to vector<32x1xf32>
    %cst_6 = arith.constant 3.906250e-03 : f32
    %6 = vector.broadcast %cst_6 : f32 to vector<32x1xf32>
    %7 = arith.mulf %5, %6 : vector<32x1xf32>
    %cst_7 = arith.constant dense<0.000000e+00> : vector<2x1xf32>
    %8 = tpu.matmul %0, %7, %cst_7 {dimension_numbers = #tpu.dot_dimension_numbers<[1], [0], [0], [1], [0, 0, 1, 1], [], []>} : vector<2x32xf32>, vector<32x1xf32>, vector<2x1xf32> -> vector<2x1xf32>
    %cst_8 = arith.constant 0.000000e+00 : f32
    %9 = vector.broadcast %cst_8 : f32 to vector<2x1xf32>
    %10 = arith.maximumf %8, %9 : vector<2x1xf32>
    %cst_9 = arith.constant dense<0.000000e+00> : vector<32x1xf32>
    %11 = tpu.matmul %1, %10, %cst_9 {dimension_numbers = #tpu.dot_dimension_numbers<[1], [0], [0], [1], [0, 0, 1, 1], [], []>} : vector<32x2xf32>, vector<2x1xf32>, vector<32x1xf32> -> vector<32x1xf32>
    %12 = arith.negf %11 : vector<32x1xf32>
    %13 = math.exp %12 : vector<32x1xf32>
    %cst_10 = arith.constant 1.000000e+00 : f32
    %14 = vector.broadcast %cst_10 : f32 to vector<32x1xf32>
    %15 = arith.addf %14, %13 : vector<32x1xf32>
    %16 = arith.divf %14, %15 : vector<32x1xf32>
    %17 = vector.broadcast %16 : vector<32x1xf32> to vector<32x256xf32>
    %18 = arith.mulf %3, %17 : vector<32x256xf32>
    %c0_11 = arith.constant 0 : index
    %c0_12 = arith.constant 0 : index
    %c0_13 = arith.constant 0 : index
    %19 = vector.load %arg4[%c0_11, %c0_12, %c0_13] : memref<2x32x256xf32, #tpu.memory_space<vmem>>, vector<1x32x256xf32>
    %20 = vector.shape_cast %19 : vector<1x32x256xf32> to vector<32x256xf32>
    %21 = vector.shape_cast %18 : vector<32x256xf32> to vector<1x32x256xf32>
    tpu.vector_store %arg4[%c0_11, %c0_12, %c0_13], %21 {strides = array<i32>} : memref<2x32x256xf32, #tpu.memory_space<vmem>>, vector<1x32x256xf32>,
    %c1 = arith.constant 1 : index
    %c0_14 = arith.constant 0 : index
    %c0_15 = arith.constant 0 : index
    %22 = vector.load %arg1[%c1, %c0_14, %c0_15] : memref<2x32x256xf32, #tpu.memory_space<vmem>>, vector<1x32x256xf32>
    %23 = vector.shape_cast %22 : vector<1x32x256xf32> to vector<32x256xf32>
    %cst_16 = arith.constant dense<0.000000e+00> : vector<32xf32>
    %24 = vector.multi_reduction <add>, %23, %cst_16 [1] : vector<32x256xf32> to vector<32xf32>
    %25 = vector.shape_cast %24 : vector<32xf32> to vector<32x1xf32>
    %cst_17 = arith.constant 3.906250e-03 : f32
    %26 = vector.broadcast %cst_17 : f32 to vector<32x1xf32>
    %27 = arith.mulf %25, %26 : vector<32x1xf32>
    %cst_18 = arith.constant dense<0.000000e+00> : vector<2x1xf32>
    %28 = tpu.matmul %0, %27, %cst_18 {dimension_numbers = #tpu.dot_dimension_numbers<[1], [0], [0], [1], [0, 0, 1, 1], [], []>} : vector<2x32xf32>, vector<32x1xf32>, vector<2x1xf32> -> vector<2x1xf32>
    %cst_19 = arith.constant 0.000000e+00 : f32
    %29 = vector.broadcast %cst_19 : f32 to vector<2x1xf32>
    %30 = arith.maximumf %28, %29 : vector<2x1xf32>
    %cst_20 = arith.constant dense<0.000000e+00> : vector<32x1xf32>
    %31 = tpu.matmul %1, %30, %cst_20 {dimension_numbers = #tpu.dot_dimension_numbers<[1], [0], [0], [1], [0, 0, 1, 1], [], []>} : vector<32x2xf32>, vector<2x1xf32>, vector<32x1xf32> -> vector<32x1xf32>
    %32 = arith.negf %31 : vector<32x1xf32>
    %33 = math.exp %32 : vector<32x1xf32>
    %cst_21 = arith.constant 1.000000e+00 : f32
    %34 = vector.broadcast %cst_21 : f32 to vector<32x1xf32>
    %35 = arith.addf %34, %33 : vector<32x1xf32>
    %36 = arith.divf %34, %35 : vector<32x1xf32>
    %37 = vector.broadcast %36 : vector<32x1xf32> to vector<32x256xf32>
    %38 = arith.mulf %23, %37 : vector<32x256xf32>
    %c1_22 = arith.constant 1 : index
    %c0_23 = arith.constant 0 : index
    %c0_24 = arith.constant 0 : index
    %39 = vector.load %arg4[%c1_22, %c0_23, %c0_24] : memref<2x32x256xf32, #tpu.memory_space<vmem>>, vector<1x32x256xf32>
    %40 = vector.shape_cast %39 : vector<1x32x256xf32> to vector<32x256xf32>
    %41 = vector.shape_cast %38 : vector<32x256xf32> to vector<1x32x256xf32>
    tpu.vector_store %arg4[%c1_22, %c0_23, %c0_24], %41 {strides = array<i32>} : memref<2x32x256xf32, #tpu.memory_space<vmem>>, vector<1x32x256xf32>,
    return
  }
  func.func @transform_0(%arg0: i32) -> (i32, i32, i32) {
    %c0_i32 = arith.constant 0 : i32
    %c0_i32_0 = arith.constant 0 : i32
    %c0_i32_1 = arith.constant 0 : i32
    return %arg0, %c0_i32, %c0_i32_0 : i32, i32, i32
  }
  func.func @transform_1(%arg0: i32) -> (i32, i32) {
    %c0_i32 = arith.constant 0 : i32
    %c0_i32_0 = arith.constant 0 : i32
    %c0_i32_1 = arith.constant 0 : i32
    return %c0_i32, %c0_i32_0 : i32, i32
  }
  func.func @transform_2(%arg0: i32) -> (i32, i32) {
    %c0_i32 = arith.constant 0 : i32
    %c0_i32_0 = arith.constant 0 : i32
    %c0_i32_1 = arith.constant 0 : i32
    return %c0_i32, %c0_i32_0 : i32, i32
  }
  func.func @transform_3(%arg0: i32) -> (i32, i32, i32) {
    %c0_i32 = arith.constant 0 : i32
    %c0_i32_0 = arith.constant 0 : i32
    %c0_i32_1 = arith.constant 0 : i32
    return %arg0, %c0_i32, %c0_i32_0 : i32, i32, i32
  }
}

</mosaic_0001>

<bundles_post_ra>
// kernel: tpu_custom_call.1
= control target key start
LH: loop header
LB: loop body
LE: loop exit
PB: predicated region body
PF: predicated region fallthrough
CT: control target
= control target key end

     0   :  { %8 = vsyncpa [#allocation3], 0  ;;  %s996_s0 = inlined_call_operand.hbm [shape: f32[2,32,256], index: 0, kind: input, shape index: {}]   ;;  %s997_s1 = inlined_call_operand.hbm [shape: f32[2,32], index: 1, kind: input, shape index: {}]   ;;  %s998_s2 = inlined_call_operand.hbm [shape: f32[32,2], index: 2, kind: input, shape index: {}]   ;;  %s999_s3 = inlined_call_operand.hbm [shape: f32[2,32,256], index: 3, kind: output, shape index: {}]  }
   0x1   :  { %9 = vsyncpa [#allocation6], 0 }
   0x2   :  { %10 = vsyncpa [#allocation4], 0  ;;  %s815_s12 = smov [#allocation5]   ;;  %s816_s14 = smov [#allocation2]  }
   0x3   :  { %s29_s13 = sshll.u32 %s815_s12, 4  ;;  %s16_s15 = sshll.u32 %s816_s14, 4  ;;  %s30_s13 = int_to_ptr.vmem [resolvable:$true] %s29_s13  ;;  %s847_s15 = int_to_ptr.vmem [resolvable:$true] %s16_s15 }
   0x4   :  { %s721_s18 = scalar_lea.hbm %s997_s1, 32 }
   0x5   :  { %p722_p0 = scmp.ne.s32.totalorder %s997_s1, %s721_s18  ;;  %p725_p1 = scmp.lt.u32.totalorder %s721_s18, %s997_s1 }
   0x7   :  { %p727_p2 = pnand %p725_p1, %p722_p0 }
   0x9   :  { %730 = shalt.err (!%p727_p2)
}
   0xa   :  { %s731_s23 = scalar_lea.vmem %s30_s13, 32  ;;  %p736_p4 = scmp.lt.s32.totalorder %s30_s13, %s30_s13 }
   0xb   :  { %p732_p3 = scmp.ne.s32.totalorder %s30_s13, %s731_s23  ;;  %p737_p5 = scmp.lt.s32.totalorder %s731_s23, %s731_s23 }
   0xd   :  { %p738_p6 = por %p737_p5, %p736_p4 }
   0xf   :  { %p739_p7 = pnand %p738_p6, %p732_p3 }
  0x11   :  { %742 = shalt.err (!%p739_p7)
}
  0x12   :  { %32 = dma.hbm_to_vmem [thread:$0]  %s997_s1, 32, %s30_s13, [#allocation6]  }
  0x13   :  { %s743_s28 = scalar_lea.hbm %s996_s0, 2048 }
  0x14   :  { %p744_p8 = scmp.ne.s32.totalorder %s996_s0, %s743_s28  ;;  %p747_p9 = scmp.lt.u32.totalorder %s743_s28, %s996_s0 }
  0x16   :  { %p749_p10 = pnand %p747_p9, %p744_p8 }
  0x18   :  { %752 = shalt.err (!%p749_p10)
}
  0x19   :  { %s753_s6 = scalar_lea.vmem %s847_s15, 2048  ;;  %p758_p12 = scmp.lt.s32.totalorder %s847_s15, %s847_s15 }
  0x1a   :  { %p754_p11 = scmp.ne.s32.totalorder %s847_s15, %s753_s6  ;;  %p759_p13 = scmp.lt.s32.totalorder %s753_s6, %s753_s6 }
  0x1c   :  { %p760_p0 = por %p759_p13, %p758_p12 }
  0x1e   :  { %p761_p1 = pnand %p760_p0, %p754_p11 }
  0x20   :  { %764 = shalt.err (!%p761_p1)
}
  0x21   :  { %s817_s1 = smov 256   ;;  %s818_s7 = smov 16  }
  0x22   :  { %22 = dma.hbm_to_vmem [thread:$0]  %s996_s0, 2048, %s847_s15, [#allocation3], %s817_s1, %s817_s1, %s818_s7  }
  0x23   :  { %s819_s10 = smov [#allocation7]   ;;  %s765_s14 = scalar_lea.hbm %s998_s2, 512 }
  0x24   :  { %s38_s11 = sshll.u32 %s819_s10, 4  ;;  %p766_p2 = scmp.ne.s32.totalorder %s998_s2, %s765_s14  ;;  %s39_s11 = int_to_ptr.vmem [resolvable:$true] %s38_s11 }
  0x25   :  { %p769_p3 = scmp.lt.u32.totalorder %s765_s14, %s998_s2 }
  0x27   :  { %p771_p4 = pnand %p769_p3, %p766_p2 }
  0x29   :  { %774 = shalt.err (!%p771_p4)
}
  0x2a   :  { %s775_s20 = scalar_lea.vmem %s39_s11, 512  ;;  %p780_p6 = scmp.lt.s32.totalorder %s39_s11, %s39_s11 }
  0x2b   :  { %p776_p5 = scmp.ne.s32.totalorder %s39_s11, %s775_s20  ;;  %p781_p7 = scmp.lt.s32.totalorder %s775_s20, %s775_s20 }
  0x2d   :  { %p782_p8 = por %p781_p7, %p780_p6 }
  0x2f   :  { %p783_p9 = pnand %p782_p8, %p776_p5 }
  0x31   :  { %786 = shalt.err (!%p783_p9)
}
  0x32   :  { %s820_s0 = smov 128   ;;  %s821_s15 = smov 8  }
  0x33   :  { %44 = dma.hbm_to_vmem [thread:$0]  %s998_s2, 512, %s39_s11, [#allocation6], %s820_s0, %s820_s0, %s821_s15  }
  0x34   :  { %809 = dma.done.wait [#allocation3], 2048  }
  0x35   :  { %810 = vsyncadd [#allocation3], 4294965248 }
  0x36   :  { %811 = dma.done.wait [#allocation6], 544  }
  0x37   :  { %812 = vsyncadd [#allocation6], 4294966752  ;;  %v893_v0 = vld [vmem:[#allocation2 + $0x20] sm:$0xff]  ;;  %v895_v1 = vld [vmem:[#allocation2 + $0x28] sm:$0xff]  ;;  %v822_v12 = vmov 0.0|0.0   ;;  %vm823_vm0 = vmmov 0  }
  0x38   :  { %v897_v2 = vld [vmem:[#allocation2] sm:$0xff]  ;;  %v73_v3 = vadd.f32 %v895_v1, %v893_v0  ;;  %v901_v4 = vld [vmem:[#allocation2 + $0x8] sm:$0xff]  ;;  %v903_v5 = vld [vmem:[#allocation2 + $0x30] sm:$0xff]  ;;  %661 = vmatprep.subr.bf16.mxu0 %v822_v12  ;;  %v824_v13 = vmov 0.0   ;;  %vm83_vm1 = vcmask 261120   ;;  %vm158_vm2 = vcmask 15360  }
  0x39   :  { %v905_v6 = vld [vmem:[#allocation2 + $0x38] sm:$0xff]  ;;  %v67_v7 = vadd.f32 %v901_v4, %v897_v2  ;;  %v909_v8 = vld [vmem:[#allocation2 + $0x10] sm:$0xff]  ;;  %631 = vmatprep.mubr.msk.f32.mxu0 %vm823_vm0, %v824_v13  ;;  %v924_v16 = vld [vmem:[#allocation2 + $0x40] sm:$0xff]  ;;  %vm171_vm3 = vcmask 1041408   ;;  %v825_v54 = vmov 0   ;;  %s826_s2 = smov [#allocation8]  }
  0x3a   :  { %v911_v9 = vld [vmem:[#allocation2 + $0x18] sm:$0xff]  ;;  %74 = vadd.xlane.f32.xlu1 %v73_v3  ;;  %v76_v10 = vadd.f32 %v905_v6, %v903_v5  ;;  %v920_v14 = vld [vmem:[#allocation2 + $0x50] sm:$0xff]  ;;  %v928_v18 = vld [vmem:[#allocation2 + $0x48] sm:$0xff]  ;;  %687 = vset.pattern.permute.xlu0 %v825_v54  ;;  %s570_s23 = sshll.u32 %s826_s2, 4  ;;  %s571_s23 = int_to_ptr.vmem [resolvable:$true] %s570_s23 }
  0x3b   :  { %68 = vadd.xlane.f32.xlu0 %v67_v7  ;;  %v70_v11 = vadd.f32 %v911_v9, %v909_v8  ;;  %v922_v15 = vld [vmem:[#allocation2 + $0x58] sm:$0xff]  ;;  %v930_v19 = vld [vmem:[#allocation2 + $0x70] sm:$0xff]  ;;  %v329_v21 = vadd.f32 %v928_v18, %v924_v16  ;;  %v936_v22 = vld [vmem:[#allocation2 + $0x60] sm:$0xff]  ;;  %688 = vset.pattern.permute.xlu1 %v825_v54  ;;  %s787_s24 = scalar_lea.vmem %s571_s23, 2048  ;;  %p792_p11 = scmp.lt.s32.totalorder %s571_s23, %s571_s23 }
  0x3c   :  { %v332_v17 = vadd.f32 %v922_v15, %v920_v14  ;;  %v932_v20 = vld [vmem:[#allocation2 + $0x78] sm:$0xff]  ;;  %v938_v23 = vld [vmem:[#allocation2 + $0x68] sm:$0xff]  ;;  %v54_v36 = vld [vmem:[#allocation5] sm:$0x3]  ;;  %p788_p10 = scmp.ne.s32.totalorder %s571_s23, %s787_s24  ;;  %p793_p12 = scmp.lt.s32.totalorder %s787_s24, %s787_s24 }
  0x3d   :  { %v338_v24 = vadd.f32 %v932_v20, %v930_v19  ;;  %v335_v25 = vadd.f32 %v938_v23, %v936_v22  ;;  %v55_v37 = vld [vmem:[#allocation7] sm:$0xff]  ;;  %v56_v50 = vld [vmem:[#allocation7 + $0x8] sm:$0xff]  ;;  %v57_v51 = vld [vmem:[#allocation7 + $0x10] sm:$0xff] }
  0x3e   :  { %77 = vadd.xlane.f32.xlu1 %v76_v10  ;;  %636 = vmatprep.mubr.msk.f32.mxu1 %vm158_vm2, %v55_v37  ;;  %v58_v53 = vld [vmem:[#allocation7 + $0x18] sm:$0xff]  ;;  %p794_p13 = por %p793_p12, %p792_p11 }
  0x3f   :  { %71 = vadd.xlane.f32.xlu0 %v70_v11 }
  0x40   :  { %p795_p0 = pnand %p794_p13, %p788_p10 }
  0x42   :  { %333 = vadd.xlane.f32.xlu1 %v332_v17 }
  0x43   :  { %330 = vadd.xlane.f32.xlu0 %v329_v21 }
  0x46   :  { %339 = vadd.xlane.f32.xlu1 %v338_v24 }
  0x47   :  { %336 = vadd.xlane.f32.xlu0 %v335_v25 }
  0xc7   :  { %v75_v26 = vpop.xlane.xlu1 %74 }
  0xc8   :  { %v69_v27 = vpop.xlane.xlu0 %68  ;;  %v81_v32 = vmul.f32 0.00390625, %v75_v26 }
  0xc9   :  { %v79_v30 = vmul.f32 0.00390625, %v69_v27 }
  0xcb   :  { %v78_v28 = vpop.xlane.xlu1 %77 }
  0xcc   :  { %v72_v29 = vpop.xlane.xlu0 %71  ;;  %v82_v33 = vmul.f32 0.00390625, %v78_v28 }
  0xcd   :  { %v80_v31 = vmul.f32 0.00390625, %v72_v29 }
  0xce   :  { %v665_v35 = vpack.c.bf16 %v82_v33, %v81_v32 }
  0xcf   :  { %v662_v34 = vpack.c.bf16 %v80_v31, %v79_v30  ;;  %v334_v38 = vpop.xlane.xlu1 %333 }
  0xd0   :  { %v331_v39 = vpop.xlane.xlu0 %330  ;;  %v342_v40 = vmul.f32 0.00390625, %v334_v38 }
  0xd1   :  { %663 = vmatpush3.bf16.msra.mxu0 %v662_v34  ;;  %v341_v41 = vmul.f32 0.00390625, %v331_v39 }
  0xd2   :  { %664 = vmatprep.subr.bf16.mxu0 %v822_v12 }
  0xd3   :  { %v340_v42 = vpop.xlane.xlu1 %339  ;;  %v668_v47 = vpack.c.bf16 %v342_v40, %v341_v41 }
  0xd4   :  { %v337_v43 = vpop.xlane.xlu0 %336  ;;  %v344_v48 = vmul.f32 0.00390625, %v340_v42 }
  0xd5   :  { %666 = vmatpush3.bf16.msra.mxu0 %v665_v35  ;;  %v343_v49 = vmul.f32 0.00390625, %v337_v43 }
  0xd7   :  { %v671_v52 = vpack.c.bf16 %v344_v48, %v343_v49 }
  0xd8   :  { %632 = vmatmul.mubr.msk.f32.vlgmr.msra.gmra.mrb[0].mxu0 %vm83_vm1, %v54_v36 }
  0xd9   :  { %655 = vmatprep.mubr.msk.f32.mxu0 %vm158_vm2, %v55_v37 }
 0x1ab   :  { %v153_v44 = vpop.f32.mrb[0].mxu0 }
 0x1ac   :  { %v157_v45 = vmax.f32 %v153_v44, 0.0  ;;  %v633_v46 = vpop.f32.mrb[1].mxu0 }
 0x1ae   :  { %634 = vmatprep.subr.msk.mxu1 %vm171_vm3, %v157_v45 }
 0x1af   :  { %635 = vmatpush3.msk.msra.mxu1 %vm171_vm3, %v157_v45 }
 0x1b0   :  { %637 = vmatmul.mubr.msk.f32.vlgmr.msra.gmra.mrb[0].mxu1 %vm158_vm2, %v56_v50  ;;  %667 = vmatprep.subr.bf16.mxu1 %v822_v12 }
 0x1b1   :  { %669 = vmatpush3.bf16.msra.mxu1 %v668_v47  ;;  %639 = vmatprep.mubr.msk.f32.mxu1 %vm158_vm2, %v57_v51 }
 0x1b2   :  { %670 = vmatprep.subr.bf16.mxu1 %v822_v12 }
 0x1b4   :  { %640 = vmatmul.mubr.msk.f32.gmra.mrb[2].mxu1 %vm158_vm2, %v58_v53 }
 0x1b5   :  { %672 = vmatpush3.bf16.msra.mxu1 %v671_v52  ;;  %650 = vmatprep.mubr.msk.f32.mxu1 %vm823_vm0, %v824_v13 }
 0x1b8   :  { %651 = vmatmul.mubr.msk.f32.vlgmr.msra.gmra.mrb[4].mxu1 %vm83_vm1, %v54_v36 }
 0x1b9   :  { %658 = vmatprep.mubr.msk.f32.mxu1 %vm158_vm2, %v57_v51 }
 0x283   :  { %v638_v55 = vpop.f32.mrb[0].mxu1 }
 0x284   :  { %v590_v56 = vmul.f32 -1.442695, %v638_v55  ;;  %v241_v57 = vpop.f32.mrb[1].mxu1 }
 0x285   :  { %v589_v58 = vmul.f32 -1.442695, %v241_v57 }
 0x286   :  { %689 = vpow2.f32 %v590_v56 }
 0x287   :  { %691 = vpow2.f32 %v589_v58  ;;  %v641_v59 = vpop.f32.mrb[2].mxu1 }
 0x288   :  { %v592_v60 = vmul.f32 -1.442695, %v641_v59  ;;  %v251_v61 = vpop.f32.mrb[3].mxu1 }
 0x289   :  { %v591_v62 = vmul.f32 -1.442695, %v251_v61 }
 0x28a   :  { %693 = vpow2.f32 %v592_v60 }
 0x28b   :  { %695 = vpow2.f32 %v591_v62  ;;  %v411_v63 = vpop.f32.mrb[4].mxu1 }
 0x28c   :  { %v415_v3 = vmax.f32 %v411_v63, 0.0  ;;  %v652_v7 = vpop.f32.mrb[5].mxu1 }
 0x28e   :  { %653 = vmatprep.subr.msk.mxu0 %vm171_vm3, %v415_v3  ;;  %673 = vmatprep.subr.msk.mxu1 %vm171_vm3, %v415_v3 }
 0x28f   :  { %654 = vmatpush3.msk.msra.mxu0 %vm171_vm3, %v415_v3  ;;  %674 = vmatpush3.msk.msra.mxu1 %vm171_vm3, %v415_v3 }
 0x290   :  { %v690_v10 = vpop.eup %689  ;;  %656 = vmatmul.mubr.msk.f32.vlgmr.msra.gmra.mrb[2].mxu0 %vm158_vm2, %v56_v50  ;;  %659 = vmatmul.mubr.msk.f32.vlgmr.msra.gmra.mrb[6].mxu1 %vm158_vm2, %v58_v53 }
 0x291   :  { %v692_v11 = vpop.eup %691  ;;  %v273_v12 = vadd.f32 1.0, %v690_v10 }
 0x292   :  { %v272_v13 = vadd.f32 1.0, %v692_v11 }
 0x293   :  { %697 = vrcp.f32 %v273_v12 }
 0x294   :  { %v694_v17 = vpop.eup %693  ;;  %699 = vrcp.f32 %v272_v13 }
 0x295   :  { %v696_v21 = vpop.eup %695  ;;  %v275_v24 = vadd.f32 1.0, %v694_v17 }
 0x296   :  { %v274_v25 = vadd.f32 1.0, %v696_v21 }
 0x297   :  { %701 = vrcp.f32 %v275_v24 }
 0x298   :  { %703 = vrcp.f32 %v274_v25 }
 0x29d   :  { %v698_v26 = vpop.eup %697 }
 0x29e   :  { %v700_v27 = vpop.eup %699  ;;  %291 = vperm.xlu1 %688, %v698_v26  }
 0x29f   :  { %286 = vperm.xlu0 %687, %v700_v27  }
 0x2a1   :  { %v702_v28 = vpop.eup %701 }
 0x2a2   :  { %301 = vperm.xlu1 %688, %v702_v28   ;;  %v704_v29 = vpop.eup %703 }
 0x2a6   :  { %296 = vperm.xlu1 %688, %v704_v29  }
 0x31d   :  { %v292_v30 = vpop.permute.xlu1 %291 }
 0x31e   :  { %v306_v31 = vmul.f32 %v292_v30, %v909_v8  ;;  %v307_v32 = vmul.f32 %v292_v30, %v911_v9  ;;  %v287_v33 = vpop.permute.xlu0 %286 }
 0x31f   :  { %v304_v34 = vmul.f32 %v287_v33, %v897_v2  ;;  %v305_v35 = vmul.f32 %v287_v33, %v901_v4 }
 0x320   :  { %314 = vst [vmem:[#allocation8 + $0x10] sm:$0xff] %v306_v31  ;;  %315 = vst [vmem:[#allocation8 + $0x18] sm:$0xff] %v307_v32 }
 0x321   :  { %312 = vst [vmem:[#allocation8] sm:$0xff] %v304_v34  ;;  %313 = vst [vmem:[#allocation8 + $0x8] sm:$0xff] %v305_v35  ;;  %v302_v36 = vpop.permute.xlu1 %301 }
 0x322   :  { %v310_v37 = vmul.f32 %v302_v36, %v903_v5  ;;  %v311_v38 = vmul.f32 %v302_v36, %v905_v6 }
 0x324   :  { %318 = vst [vmem:[#allocation8 + $0x30] sm:$0xff] %v310_v37  ;;  %319 = vst [vmem:[#allocation8 + $0x38] sm:$0xff] %v311_v38 }
 0x325   :  { %v297_v39 = vpop.permute.xlu1 %296 }
 0x326   :  { %v308_v8 = vmul.f32 %v297_v39, %v893_v0  ;;  %v309_v9 = vmul.f32 %v297_v39, %v895_v1 }
 0x328   :  { %316 = vst [vmem:[#allocation8 + $0x20] sm:$0xff] %v308_v8  ;;  %317 = vst [vmem:[#allocation8 + $0x28] sm:$0xff] %v309_v9 }
 0x363   :  { %v657_v2 = vpop.f32.mrb[2].mxu0  ;;  %v660_v4 = vpop.f32.mrb[6].mxu1 }
 0x364   :  { %v600_v40 = vmul.f32 -1.442695, %v657_v2  ;;  %v485_v41 = vpop.f32.mrb[3].mxu0  ;;  %v495_v42 = vpop.f32.mrb[7].mxu1  ;;  %v602_v5 = vmul.f32 -1.442695, %v660_v4 }
 0x365   :  { %v599_v43 = vmul.f32 -1.442695, %v485_v41  ;;  %v601_v44 = vmul.f32 -1.442695, %v495_v42 }
 0x366   :  { %705 = vpow2.f32 %v600_v40 }
 0x367   :  { %707 = vpow2.f32 %v599_v43 }
 0x368   :  { %709 = vpow2.f32 %v601_v44 }
 0x369   :  { %711 = vpow2.f32 %v602_v5 }
 0x370   :  { %v706_v6 = vpop.eup %705 }
 0x371   :  { %v708_v45 = vpop.eup %707  ;;  %v517_v46 = vadd.f32 1.0, %v706_v6 }
 0x372   :  { %v710_v0 = vpop.eup %709  ;;  %v516_v1 = vadd.f32 1.0, %v708_v45 }
 0x373   :  { %713 = vrcp.f32 %v517_v46  ;;  %v518_v47 = vadd.f32 1.0, %v710_v0  ;;  %v712_v48 = vpop.eup %711 }
 0x374   :  { %715 = vrcp.f32 %v516_v1  ;;  %v519_v49 = vadd.f32 1.0, %v712_v48 }
 0x375   :  { %717 = vrcp.f32 %v518_v47 }
 0x376   :  { %719 = vrcp.f32 %v519_v49 }
 0x37d   :  { %v714_v50 = vpop.eup %713 }
 0x37e   :  { %535 = vperm.xlu1 %688, %v714_v50   ;;  %v716_v51 = vpop.eup %715 }
 0x37f   :  { %v718_v52 = vpop.eup %717 }
 0x380   :  { %v720_v53 = vpop.eup %719 }
 0x382   :  { %530 = vperm.xlu1 %688, %v716_v51  }
 0x386   :  { %540 = vperm.xlu1 %688, %v718_v52  }
 0x38a   :  { %545 = vperm.xlu1 %688, %v720_v53  }
 0x3fd   :  { %v536_v54 = vpop.permute.xlu1 %535 }
 0x3fe   :  { %v550_v55 = vmul.f32 %v536_v54, %v920_v14  ;;  %v551_v56 = vmul.f32 %v536_v54, %v922_v15 }
 0x400   :  { %559 = vst [vmem:[#allocation8 + $0x50] sm:$0xff] %v550_v55  ;;  %560 = vst [vmem:[#allocation8 + $0x58] sm:$0xff] %v551_v56 }
 0x401   :  { %v531_v57 = vpop.permute.xlu1 %530 }
 0x402   :  { %v548_v58 = vmul.f32 %v531_v57, %v924_v16  ;;  %v549_v59 = vmul.f32 %v531_v57, %v928_v18 }
 0x404   :  { %557 = vst [vmem:[#allocation8 + $0x40] sm:$0xff] %v548_v58  ;;  %558 = vst [vmem:[#allocation8 + $0x48] sm:$0xff] %v549_v59 }
 0x405   :  { %v541_v60 = vpop.permute.xlu1 %540 }
 0x406   :  { %v552_v61 = vmul.f32 %v541_v60, %v936_v22  ;;  %v553_v62 = vmul.f32 %v541_v60, %v938_v23 }
 0x408   :  { %561 = vst [vmem:[#allocation8 + $0x60] sm:$0xff] %v552_v61  ;;  %562 = vst [vmem:[#allocation8 + $0x68] sm:$0xff] %v553_v62 }
 0x409   :  { %v546_v14 = vpop.permute.xlu1 %545 }
 0x40a   :  { %v554_v15 = vmul.f32 %v546_v14, %v930_v19  ;;  %v555_v63 = vmul.f32 %v546_v14, %v932_v20 }
 0x40c   :  { %563 = vst [vmem:[#allocation8 + $0x70] sm:$0xff] %v554_v15  ;;  %564 = vst [vmem:[#allocation8 + $0x78] sm:$0xff] %v555_v63 }
 0x40d   :  { %798 = shalt.err (!%p795_p0)
}
 0x40e   :  { %s799_s27 = scalar_lea.hbm %s999_s3, 2048 }
 0x40f   :  { %p800_p1 = scmp.ne.s32.totalorder %s999_s3, %s799_s27  ;;  %p803_p2 = scmp.lt.u32.totalorder %s799_s27, %s999_s3 }
 0x411   :  { %p805_p3 = pnand %p803_p2, %p800_p1 }
 0x413   :  { %808 = shalt.err (!%p805_p3)
}
 0x414   :  { %576 = dma.vmem_to_hbm [thread:$0]  %s571_s23, 2048, %s999_s3, [#allocation4], %s817_s1, %s817_s1, %s818_s7  }
 0x415   :  { %813 = dma.done.wait [#allocation4], 2048  }
 0x416   :  { %814 = vsyncadd [#allocation4], 4294965248 }
 0x417   :  { %580 = vsyncpa [#allocation3], 1 }
 0x418   :  { %581 = vsyncpa [#allocation6], 1 }
 0x419   :  { %582 = vsyncpa [#allocation4], 1 }

</bundles_post_ra>
